<compile_context>
chip_gen: v6e
topology: v6e:2x2x1
jax: 0.10.0
libtpu: 0.0.40
codegen_flags: <defaults>
</compile_context>

<pallas_src>
import functools

import jax
import jax.numpy as jnp
from jax.experimental import pallas as pl
from jax.experimental.pallas import tpu as pltpu

_MiB = 1024 * 1024


def _mean_pool_kernel(x_ref, o_ref, acc_ref, *, inv_hw):
    """x_ref: (R, HWb) input block, o_ref: (R, 1) output block,
    acc_ref: (R, 1) f32 scratch accumulator.

    Grid is (row_blocks, hw_blocks); the hw axis (last, "arbitrary") is the
    reduction axis, so the output block is resident across it."""
    j = pl.program_id(1)

    @pl.when(j == 0)
    def _():
        acc_ref[...] = jnp.zeros_like(acc_ref)

    # f32-accumulated lane reduction of the (possibly bf16) tile.
    acc_ref[...] += jnp.sum(x_ref[...], axis=1, keepdims=True, dtype=jnp.float32)

    @pl.when(j == pl.num_programs(1) - 1)
    def _():
        o_ref[...] = (acc_ref[...] * inv_hw).astype(o_ref.dtype)


def _sublane_multiple(dtype):
    bits = jnp.dtype(dtype).itemsize * 8
    return 8 if bits >= 32 else (32 // bits) * 8  # 8 f32 / 16 bf16 / 32 int8


def _vmem_block_budget_bytes():
    """Per-input-block VMEM byte budget, sized per chip generation.

    Keeps 2x(input block) + output + scratch comfortably under the 32 MiB
    scoped limit we request and well under v7x's 64 MiB physical VMEM."""
    try:
        vmem = getattr(pltpu.get_tpu_info(), "vmem_capacity_bytes", None)
    except Exception:
        vmem = None
    if vmem is None:
        return 8 * _MiB            # safe fallback on every generation
    if vmem <= 80 * _MiB:          # v7x-class: 64 MiB physical per TensorCore
        return 10 * _MiB
    return 12 * _MiB               # v5e/v6e-class: 128 MiB physical


def _choose_block_hw(hw, itemsize, sublane, budget):
    """Lane-dim chunk.  Full H*W unless a single row is so large (>=512 KiB)
    that a minimum-height block would blow the VMEM budget; then pick the
    largest multiple-of-128 divisor of H*W that fits (no padded lanes enter
    the reduction)."""
    if hw * itemsize < 512 * 1024 or hw % 128 != 0:
        return hw
    max_chunk = max(128, (budget // (sublane * itemsize)) // 128 * 128)
    if hw <= max_chunk:
        return hw
    q = hw // 128
    best = 128
    for d in range(1, q + 1):
        cand = 128 * d
        if q % d == 0 and cand <= max_chunk:
            best = cand
    return best


def _choose_block_rows(rows, block_hw, itemsize, sublane, budget,
                       min_steps=4, max_rows=32768):
    """Rows per block: byte-budget-limited (no artificial 1K cap), rounded to
    the dtype sublane multiple, and kept small enough that the parallel row
    axis has >= min_steps grid steps (megacore sharding on v7x)."""
    row_bytes = max(1, block_hw * itemsize)
    r = (budget // row_bytes // sublane) * sublane
    r = max(sublane, min(r, max_rows))
    if rows >= sublane * min_steps:
        per_step = max(sublane, (-(-rows // min_steps) // sublane) * sublane)
        r = min(r, per_step)
    return rows if rows <= r else r


def attention_average(x, sequence, img_dim):
    """x: (N, C, H, W) float array. Returns mean over H and W reshaped to
    (-1, sequence, img_dim), matching Attention_average.forward."""
    N, C, H, W = x.shape
    rows = N * C
    hw = H * W
    itemsize = jnp.dtype(x.dtype).itemsize

    # Free reshape for contiguous NCHW: (N, C, H, W) -> (N*C, H*W).
    x2 = x.reshape(rows, hw)

    budget = _vmem_block_budget_bytes()
    sublane = _sublane_multiple(x.dtype)
    block_hw = _choose_block_hw(hw, itemsize, sublane, budget)
    block_rows = _choose_block_rows(rows, block_hw, itemsize, sublane, budget)

    grid = (pl.cdiv(rows, block_rows), pl.cdiv(hw, block_hw))
    inv_hw = 1.0 / float(hw)

    # Explicit scoped-VMEM request: double-buffered input blocks + output +
    # scratch + margin, never below 32 MiB (safe on v5e/v6e/v7x).
    block_in_bytes = block_rows * block_hw * itemsize
    vmem_limit = int(max(32 * _MiB,
                         2 * block_in_bytes
                         + 2 * block_rows * itemsize
                         + block_rows * 4
                         + 2 * _MiB))

    kernel = functools.partial(_mean_pool_kernel, inv_hw=inv_hw)

    pooled = pl.pallas_call(
        kernel,
        out_shape=jax.ShapeDtypeStruct((rows, 1), x.dtype),
        grid=grid,
        in_specs=[pl.BlockSpec((block_rows, block_hw), lambda i, j: (i, j))],
        out_specs=pl.BlockSpec((block_rows, 1), lambda i, j: (i, 0)),
        scratch_shapes=[pltpu.VMEM((block_rows, 1), jnp.float32)],
        compiler_params=pltpu.CompilerParams(
            dimension_semantics=("parallel", "arbitrary"),
            vmem_limit_bytes=vmem_limit,
        ),
        cost_estimate=pl.CostEstimate(
            flops=rows * hw + rows,
            transcendentals=0,
            bytes_accessed=rows * hw * itemsize + rows * itemsize,
        ),
    )(x2)

    # Glue: same as .view(-1, sequence, img_dim) in PyTorch.
    return pooled.reshape(-1, sequence, img_dim)


if __name__ == "__main__":
    # Module config (Attention_average(sequence, img_dim, kernel_size) has no
    # learned parameters; kernel_size is unused in forward).
    sequence = 4
    img_dim = 8
    batch = 2
    H = W = 16

    # Input consistent with the forward's view(-1, sequence, img_dim):
    # N = batch * sequence, C = img_dim.
    key = jax.random.PRNGKey(0)
    x = jax.random.normal(key, (batch * sequence, img_dim, H, W), dtype=jnp.float32)

    out = attention_average(x, sequence, img_dim)
    out = jax.block_until_ready(out)

    # Sanity check against a pure-JAX reference.
    ref = jnp.mean(jnp.mean(x, axis=3), axis=2).reshape(-1, sequence, img_dim)
    assert out.shape == (batch, sequence, img_dim), out.shape
    assert jnp.allclose(out, ref, atol=1e-5, rtol=1e-5)

    print("KERNEL_OK")
</pallas_src>

<mosaic_0001>
module attributes {stable_mosaic.version = 11 : i64} {
  func.func @_mean_pool_kernel(%arg0: i32, %arg1: i32, %arg2: memref<16x256xf32, #tpu.memory_space<vmem>>, %arg3: memref<16x1xf32, #tpu.memory_space<vmem>>, %arg4: memref<16x1xf32, #tpu.memory_space<vmem>>) attributes {dimension_semantics = [#tpu.dimension_semantics<parallel>, #tpu.dimension_semantics<arbitrary>], iteration_bounds = array<i64: 4, 1>, scalar_prefetch = 0 : i64, scratch_operands = 1 : i64, tpu.core_type = #tpu.core_type<tc>, window_params = [{transform_indices = @transform_0, window_bounds = array<i64: 16, 256>}, {transform_indices = @transform_1, window_bounds = array<i64: 16, 1>}]} {
    %c0_i32 = arith.constant 0 : i32
    %0 = arith.cmpi eq, %arg1, %c0_i32 : i32
    %1 = arith.extui %0 : i1 to i32
    %c0_i32_0 = arith.constant 0 : i32
    %2 = arith.cmpi ne, %1, %c0_i32_0 : i32
    scf.if %2 {
      %cst_8 = arith.constant 0.000000e+00 : f32
      %12 = vector.broadcast %cst_8 : f32 to vector<16x1xf32>
      %c0_9 = arith.constant 0 : index
      %c0_10 = arith.constant 0 : index
      %13 = vector.load %arg4[%c0_9, %c0_10] : memref<16x1xf32, #tpu.memory_space<vmem>>, vector<16x1xf32>
      tpu.vector_store %arg4[%c0_9, %c0_10], %12 {strides = array<i32>} : memref<16x1xf32, #tpu.memory_space<vmem>>, vector<16x1xf32>,
    } else {
    }
    %c0 = arith.constant 0 : index
    %c0_1 = arith.constant 0 : index
    %3 = vector.load %arg4[%c0, %c0_1] : memref<16x1xf32, #tpu.memory_space<vmem>>, vector<16x1xf32>
    %c0_2 = arith.constant 0 : index
    %c0_3 = arith.constant 0 : index
    %4 = vector.load %arg2[%c0_2, %c0_3] : memref<16x256xf32, #tpu.memory_space<vmem>>, vector<16x256xf32>
    %cst = arith.constant dense<0.000000e+00> : vector<16xf32>
    %5 = vector.multi_reduction <add>, %4, %cst [1] : vector<16x256xf32> to vector<16xf32>
    %6 = vector.shape_cast %5 : vector<16xf32> to vector<16x1xf32>
    %7 = arith.addf %3, %6 : vector<16x1xf32>
    %c0_4 = arith.constant 0 : index
    %c0_5 = arith.constant 0 : index
    %8 = vector.load %arg4[%c0_4, %c0_5] : memref<16x1xf32, #tpu.memory_space<vmem>>, vector<16x1xf32>
    tpu.vector_store %arg4[%c0_4, %c0_5], %7 {strides = array<i32>} : memref<16x1xf32, #tpu.memory_space<vmem>>, vector<16x1xf32>,
    %c0_i32_6 = arith.constant 0 : i32
    %9 = arith.cmpi eq, %arg1, %c0_i32_6 : i32
    %10 = arith.extui %9 : i1 to i32
    %c0_i32_7 = arith.constant 0 : i32
    %11 = arith.cmpi ne, %10, %c0_i32_7 : i32
    scf.if %11 {
      %c0_8 = arith.constant 0 : index
      %c0_9 = arith.constant 0 : index
      %12 = vector.load %arg4[%c0_8, %c0_9] : memref<16x1xf32, #tpu.memory_space<vmem>>, vector<16x1xf32>
      %cst_10 = arith.constant 3.906250e-03 : f32
      %13 = vector.broadcast %cst_10 : f32 to vector<16x1xf32>
      %14 = arith.mulf %12, %13 : vector<16x1xf32>
      %c0_11 = arith.constant 0 : index
      %c0_12 = arith.constant 0 : index
      %15 = vector.load %arg3[%c0_11, %c0_12] : memref<16x1xf32, #tpu.memory_space<vmem>>, vector<16x1xf32>
      tpu.vector_store %arg3[%c0_11, %c0_12], %14 {strides = array<i32>} : memref<16x1xf32, #tpu.memory_space<vmem>>, vector<16x1xf32>,
    } else {
    }
    return
  }
  func.func @transform_0(%arg0: i32, %arg1: i32) -> (i32, i32) {
    %c0_i32 = arith.constant 0 : i32
    return %arg0, %arg1 : i32, i32
  }
  func.func @transform_1(%arg0: i32, %arg1: i32) -> (i32, i32) {
    %c0_i32 = arith.constant 0 : i32
    %c0_i32_0 = arith.constant 0 : i32
    return %arg0, %c0_i32 : i32, i32
  }
}

</mosaic_0001>

<bundles_post_ra>
// kernel: tpu_custom_call.1
= control target key start
LH: loop header
LB: loop body
LE: loop exit
PB: predicated region body
PF: predicated region fallthrough
CT: control target
= control target key end

     0   :  { %6 = vsyncpa [#allocation4], 0  ;;  %s538_s0 = inlined_call_operand.hbm [shape: f32[64,256], index: 0, kind: input, shape index: {}]   ;;  %s539_s1 = inlined_call_operand.vmem [shape: f32[64,1], index: 1, kind: output, shape index: {}]  }
   0x1   :  { %8 = vsyncpa [#allocation4 + $0x1], 0  ;;  %s437_s6 = smov 0   ;;  %s439_s7 = smov 0  }
   0x2   :  { %s441_s8 = smov 0   ;;  %s443_s9 = smov 0  }
   0x3   :  { %s445_s10 = smov 0   ;;  %s447_s11 = smov 0  }
   0x4 LB: > { %s269_s12 = sadd.s32 4294967295, %s421_s11   ;;  %s26_s13 = sadd.s32 1, %s417_s10  ;;  %s421_s11 = sphi %s447_s11, %s14_s11   ;;  %s417_s10 = sphi %s445_s10, %s547_s10   ;;  %s413_s9 = sphi %s443_s9, %s546_s9   ;;  %s409_s8 = sphi %s441_s8, %s545_s8   ;;  %s405_s7 = sphi %s439_s7, %s544_s7   ;;  %s401_s6 = sphi %s437_s6, %s543_s6  }
   0x5   : > { %p28_p0 = scmp.ge.s32.totalorder %s26_s13, 4  ;;  %s35_s14 = sadd.s32 1, %s409_s8 }
   0x6   : > { %p42_p1 = scmp.ne.s32.totalorder %s409_s8, %s405_s7  ;;  %p43_p2 = scmp.eq.s32.totalorder %s421_s11, 0 }
   0x7   : > { %s549_s13 = smov (%p28_p0, %s26_s13), 0  ;;  %p48_p4 = scmp.ne.s32.totalorder %s405_s7, %s401_s6 }
   0x8   : > { %p473_p3 = por %p43_p2, %p42_p1  ;;  %s30_s16 = ssub.s32 %s417_s10, %s549_s13 }
   0x9   : > { %p49_p5 = scmp.eq.s32.totalorder %s269_s12, 0  ;;  %p33_p6 = scmp.eq.s32.totalorder %s30_s16, 0 }
   0xa   : > { %p291_p8 = scmp.lt.s32.totalorder %s421_s11, 4  ;;  %s98_s19 = sand.u32 1, %s409_s8  }
   0xb   : > { %p480_p7 = por %p49_p5, %p48_p4  ;;  %s284_s20 = sshll.u32 %s417_s10, 9 }
   0xc   : > { %s486_s18 = scalar_select %p33_p6, %s409_s8, %s35_s14  }
   0xd   : > { %s273_s21 = sshll.u32 %s98_s19, 5  ;;  %s111_s24 = scalar_lea.hbm %s538_s0, %s284_s20 }
   0xe   : > { %s102_s25 = scalar_lea.vmem [#allocation3], %s273_s21  ;;  %p495_p9 = pnand %p291_p8, %p473_p3 }
   0xf   : > { %s112_s26 = sshll.u32 %s102_s25, 4  ;;  %s99_s28 = scalar_lea.sflag [#allocation4], %s98_s19  ;;  %s113_s26 = int_to_ptr.vmem [resolvable:$true] %s112_s26 }
  0x10   : > { %p345_p10 = pneg %p495_p9  ;;  %s356_s29 = scalar_lea.vmem %s113_s26, 512 }
  0x11   : > { %p357_p11 = scmp.ne.s32.totalorder %s113_s26, %s356_s29  ;;  %s423_s30 = smov [#allocation3]  }
  0x12   : > { %s361_s2 = sshll.u32 %s423_s30, 4  ;;  %s362_s2 = int_to_ptr.vmem [resolvable:$false] %s361_s2 }
  0x13   : > { %p359_p12 = pnand %p357_p11, %p345_p10  ;;  %s363_s3 = scalar_lea.vmem %s362_s2, 1024 }
  0x14   : > { %p364_p0 = scmp.lt.s32.totalorder %s113_s26, %s362_s2  ;;  %p365_p1 = scmp.lt.s32.totalorder %s363_s3, %s356_s29 }
  0x15   : > { %p360_p13 = pneg %p359_p12 }
  0x16   : > { %p366_p2 = por %p365_p1, %p364_p0 }
  0x18   : > { %p367_p3 = pnand %p366_p2, %p360_p13 }
  0x1a   : > { %370 = shalt.err (!%p367_p3)
}
  0x1b   : > { %s424_s4 = smov 256   ;;  %s425_s5 = smov 16  }
  0x1c   : > { %290 = dma.hbm_to_vmem [thread:$0]  (!%p495_p9), %s111_s24, 512, %s113_s26, %s99_s28, %s424_s4, %s424_s4, %s425_s5  }
  0x1d   : > { %p277_p4 = scmp.ge.s32.totalorder %s421_s11, 1  ;;  %p120_p5 = scmp.lt.s32.totalorder %s421_s11, 5 }
  0x1f   : > { %p121_p6 = pnand %p277_p4, %p120_p5 }
  0x20   : > { %s126_s6 = sand.u32 (!%p121_p6), 1, %s405_s7  }
  0x21   : > { %124 = sbr.rel (%p121_p6) target bundleno = 197 (0xc5), region = 24  ;;  %s278_s12 = sshll.u32 (!%p121_p6), %s126_s6, 5 }
  0x22   : > { %s127_s14 = scalar_lea.sflag (!%p121_p6), [#allocation4], %s126_s6  ;;  %s130_s15 = scalar_lea.vmem (!%p121_p6), [#allocation3], %s278_s12 }
  0x26   : > { %396 = dma.done.wait (%p480_p7), %s127_s14, 512  }
  0x27   : > { %398 = vsyncadd (%p480_p7), %s127_s14, 4294966784  ;;  %vm161_vm0 = vcmask 7168   ;;  %v426_v0 = vmov 0.0   ;;  %v166_v1 = vld [vmem:[%s130_s15] sm:$0xff]  ;;  %v167_v2 = vld [vmem:[%s130_s15 + $0x8] sm:$0xff]  ;;  %s279_s16 = sshll.u32 %s413_s9, 1 }
  0x28   : > { %162 = vst.msk [vmem:[#allocation2] sm:$0xff] %vm161_vm0, %v426_v0  ;;  %163 = vst.msk [vmem:[#allocation2 + $0x8] sm:$0xff] %vm161_vm0, %v426_v0  ;;  %v168_v3 = vld [vmem:[%s130_s15 + $0x10] sm:$0xff]  ;;  %v170_v4 = vadd.f32 %v167_v2, %v166_v1  ;;  %v169_v5 = vld [vmem:[%s130_s15 + $0x18] sm:$0xff]  ;;  %p152_p8 = scmp.lt.s32.totalorder %s279_s16, 7 }
  0x29   : > { %v173_v6 = vadd.f32 %v169_v5, %v168_v3 }
  0x2a   : > { %171 = vadd.xlane.f32.xlu0 %v170_v4  ;;  %s551_s16 = smov (!%p152_p8, %s279_s16), 7 }
  0x2b   : > { %s280_s17 = sshll.u32 %s551_s16, 3 }
  0x2c   : > { %s155_s21 = scalar_lea.vmem %s539_s1, %s280_s17 }
  0x2e   : > { %174 = vadd.xlane.f32.xlu0 %v173_v6 }
  0x2f   : > { %v164_v7 = vld [vmem:[#allocation2] sm:$0xff]  ;;  %v165_v10 = vld [vmem:[#allocation2 + $0x8] sm:$0xff] }
  0xb3   : > { %v172_v8 = vpop.xlane.xlu0 %171 }
  0xb4   : > { %v176_v9 = vadd.f32 %v172_v8, %v164_v7 }
  0xb6   : > { %179 = vst.msk [vmem:[#allocation2] sm:$0xff] %vm161_vm0, %v176_v9 }
  0xb7   : > { %v175_v11 = vpop.xlane.xlu0 %174 }
  0xb8   : > { %v177_v12 = vadd.f32 %v175_v11, %v165_v10 }
  0xba   : > { %180 = vst.msk [vmem:[#allocation2 + $0x8] sm:$0xff] %vm161_vm0, %v177_v12 }
  0xbd   : > { %v184_v13 = vld [vmem:[#allocation2] sm:$0xff] }
  0xbe   : > { %v186_v14 = vmul.f32 0.00390625, %v184_v13 }
  0xc0   : > { %188 = vst.msk [vmem:[%s155_s21] sm:$0xff] %vm161_vm0, %v186_v14 }
  0xc1   : > { %v185_v15 = vld [vmem:[#allocation2 + $0x8] sm:$0xff] }
  0xc2   : > { %v187_v16 = vmul.f32 0.00390625, %v185_v15 }
  0xc4   : > { %189 = vst.msk [vmem:[%s155_s21 + $0x8] sm:$0xff] %vm161_vm0, %v187_v16 }
  0xc5 PF: > { %s14_s11 = sadd.s32 1, %s421_s11   ;;  %s543_s6 = smov %s405_s7 }
  0xc6   : > { %p11_p7 = scmp.ge.s32.totalorder %s14_s11, 6   ;;  %s544_s7 = smov %s409_s8 }
  0xc7   : > { %s545_s8 = smov %s486_s18  ;;  %s546_s9 = smov %s417_s10 }
  0xc8   : > { %s547_s10 = smov %s549_s13  ;;  %13 = sbr.rel (!%p11_p7) target bundleno = 4 (0x4), region = 72 }
  0xcd   :  { %212 = vsyncpa [#allocation4], 1 }
  0xce   :  { %214 = vsyncpa [#allocation4 + $0x1], 1 }

</bundles_post_ra>
